<compile_context>
chip_gen: v7x
topology: tpu7x:2x2x1
jax: 0.10.0
libtpu: 0.0.40
codegen_flags: <defaults>
</compile_context>

<pallas_src>
import math
import jax
import jax.numpy as jnp
from jax.experimental import pallas as pl
from jax.experimental.pallas import tpu as pltpu

VERY_NEG_NUMBER = -100000000000.0


def _attn_kernel(e_ref, m_ref, c_ref, u2_ref, o_ref):
    """Per-tile body.

    e_ref  : (TB, L, D)  encoder outputs (native dtype, e.g. f32 or bf16)
    m_ref  : (TB, L)     query mask (lane-dense)
    c_ref  : (TB, 1)     per-batch scalar  h_b @ (W1^T v) + b.v   (f32)
    u2_ref : (1, D)      folded weight     W2^T v                 (native dtype)
    o_ref  : (TB, L)     attention weights (lane-dense, f32)
    """
    e = e_ref[...]                                     # native dtype, no upcast
    u2 = u2_ref[...]                                   # (1, D) native dtype

    # Multiply in the native input dtype, accumulate the score in f32.
    # (Only the (TB, L) score needs f32 for tanh / softmax.)
    prod = e * u2[jnp.newaxis, :, :]                   # (TB, L, D) native dtype
    score = jnp.sum(prod, axis=-1, dtype=jnp.float32)  # (TB, L) f32
    score = score + c_ref[...]                         # broadcast (TB, 1)

    m = m_ref[...].astype(jnp.float32)                 # (TB, L)
    energies = jnp.tanh(score) + (1.0 - m) * VERY_NEG_NUMBER

    # Softmax over the sequence axis (lane axis here == dim=1 of the module).
    mx = jnp.max(energies, axis=-1, keepdims=True)
    ex = jnp.exp(energies - mx)
    denom = jnp.sum(ex, axis=-1, keepdims=True)
    r = pl.reciprocal(denom, approx=True)              # EUP slot (cheap)
    r = r * (2.0 - denom * r)                          # Newton refinement ->
    r = r * (2.0 - denom * r)                          #   full f32 accuracy
    o_ref[...] = (ex * r).astype(o_ref.dtype)


def _vmem_capacity_bytes(default=64 << 20):
    """Physical VMEM of the current TPU generation (conservative fallback)."""
    try:
        info = pltpu.get_tpu_info()
    except Exception:
        return default
    for name in ("vmem_capacity_bytes", "vmem_size_bytes", "vmem_bytes"):
        val = getattr(info, name, None)
        if val:
            return int(val)
    return default


def _choose_batch_tile(B, L, D, itemsize, vmem_cap_bytes):
    """Pick the batch tile TB and estimate the per-step VMEM working set.

    The estimate accounts for:
      * the double-buffered encoder tile, lane-padded to >=128 along D and
        sublane-padded to a multiple of 8 along L (this is where D < 128
        costs VMEM, so it must be budgeted, not ignored),
      * double-buffered mask / output (TB, L) blocks,
      * ~4 f32 (TB, L) in-kernel temporaries (score / energies / exp / out).

    Returns (TB, estimated_vmem_bytes_for_that_TB).
    """
    d_pad = max(128, -(-D // 128) * 128)
    l_pad = -(-L // 8) * 8
    enc_row = l_pad * d_pad * itemsize        # encoder bytes per batch row (VMEM)
    small_row = l_pad * 4                     # one f32 (1, L) slab
    per_row = 2 * enc_row + 4 * small_row + 4 * small_row

    # Use at most ~1/3 of physical VMEM for this kernel's working set; this
    # sits inside the 16 / 32 MiB scoped defaults of v5e / v6e / v7x with room
    # for the compiler's own scratch.
    budget = min(vmem_cap_bytes // 3, 24 << 20)
    tb = max(1, int(budget // per_row))

    if tb >= B:
        tb = B
        # Megacore (v7x has 2 TCs): give the "parallel" batch axis >= 2 grid
        # steps whenever the 8-row block alignment allows it.
        if B >= 16:
            tb = max(8, ((B // 2) // 8) * 8)
    else:
        # (TB, L) blocks need TB % 8 == 0 unless TB == B.
        tb = max(8, (tb // 8) * 8) if B >= 8 else B
        tb = min(tb, B)

    est = tb * per_row + 2 * (d_pad * itemsize) + 2 * 8 * 4   # + u2 / c blocks
    return int(tb), int(est)


def attn_forward(hidden, encoder_outputs, query_mask, w, b, v):
    """hidden (B,1,D), encoder_outputs (B,L,D) [f32 or bf16], query_mask
    (B,L,1), w (D, 2D) torch-layout Linear weight, b (D,), v (D,).
    Returns attention weights (B, L, 1) in float32.

    Feeding encoder_outputs as bf16 roughly halves HBM traffic (the kernel is
    purely bandwidth-bound); score / softmax math stays in f32 either way.
    """
    B, L, D = encoder_outputs.shape
    enc_dtype = encoder_outputs.dtype
    f32 = jnp.float32

    # Fold the v projection into the Linear (no nonlinearity between them).
    w32 = jnp.asarray(w, f32)
    b32 = jnp.asarray(b, f32)
    v32 = jnp.asarray(v, f32)
    u1 = v32 @ w32[:, :D]                                   # (D,)  = W1^T v
    u2 = (v32 @ w32[:, D:]).reshape(1, D).astype(enc_dtype)  # (1,D) = W2^T v
    c = (hidden[:, 0, :].astype(f32) @ u1 + jnp.dot(b32, v32)).reshape(B, 1)

    mask2d = query_mask.reshape(B, L)                       # lane-dense mask

    itemsize = jnp.dtype(enc_dtype).itemsize
    vmem_cap = _vmem_capacity_bytes()
    TB, est = _choose_batch_tile(B, L, D, itemsize, vmem_cap)

    if est > vmem_cap * 3 // 4:
        # TODO(synk): tile L with a two-pass softmax for shapes where even an
        # 8-row (or single-row) batch tile does not fit this generation's VMEM.
        raise ValueError(
            f"Attn kernel working set ({est} B) exceeds the VMEM budget "
            f"({vmem_cap * 3 // 4} B) for shape B={B}, L={L}, D={D}.")

    vmem_limit = int(min(vmem_cap * 3 // 4, max(est + (4 << 20), 16 << 20)))
    grid = (pl.cdiv(B, TB),)

    out2d = pl.pallas_call(
        _attn_kernel,
        out_shape=jax.ShapeDtypeStruct((B, L), f32),
        grid_spec=pltpu.PrefetchScalarGridSpec(
            num_scalar_prefetch=0,
            grid=grid,
            in_specs=[
                pl.BlockSpec((TB, L, D), lambda i: (i, 0, 0)),   # encoder tile
                pl.BlockSpec((TB, L), lambda i: (i, 0)),         # mask tile
                pl.BlockSpec((TB, 1), lambda i: (i, 0)),         # per-batch scalar
                pl.BlockSpec((1, D), lambda i: (0, 0)),          # folded weight
            ],
            out_specs=pl.BlockSpec((TB, L), lambda i: (i, 0)),
        ),
        compiler_params=pltpu.CompilerParams(
            dimension_semantics=("parallel",),
            vmem_limit_bytes=vmem_limit),
    )(encoder_outputs, mask2d, c, u2)

    return out2d.reshape(B, L, 1)


def _reference(hidden, encoder_outputs, query_mask, w, b, v):
    B, L, D = encoder_outputs.shape
    H = jnp.broadcast_to(hidden, (B, L, D))
    cat = jnp.concatenate([H, encoder_outputs], axis=-1)      # (B, L, 2D)
    energy = cat @ w.T + b                                    # (B, L, D)
    score = energy @ v.reshape(D, 1)                          # (B, L, 1)
    e = jnp.tanh(score) + (1.0 - query_mask) * VERY_NEG_NUMBER
    return jax.nn.softmax(e, axis=1)


if __name__ == "__main__":
    B, L, D = 2, 8, 32
    key = jax.random.PRNGKey(0)
    k1, k2, k3, k4, k5, k6 = jax.random.split(key, 6)

    hidden = jax.random.normal(k1, (B, 1, D), jnp.float32)
    encoder_outputs = jax.random.normal(k2, (B, L, D), jnp.float32)
    # binary mask with a few masked positions
    query_mask = (jax.random.uniform(k3, (B, L, 1)) > 0.25).astype(jnp.float32)

    # deterministic parameter init mimicking nn.Linear / the module's v init
    stdv_lin = 1.0 / math.sqrt(2 * D)
    w = jax.random.uniform(k4, (D, 2 * D), jnp.float32, -stdv_lin, stdv_lin)
    b = jax.random.uniform(k5, (D,), jnp.float32, -stdv_lin, stdv_lin)
    stdv_v = 1.0 / math.sqrt(D)
    v = jax.random.uniform(k6, (D,), jnp.float32, -stdv_v, stdv_v)

    out = attn_forward(hidden, encoder_outputs, query_mask, w, b, v)
    out = jax.block_until_ready(out)

    ref = _reference(hidden, encoder_outputs, query_mask, w, b, v)
    assert out.shape == (B, L, 1)
    assert jnp.allclose(out, ref, atol=1e-5, rtol=1e-5), "mismatch vs reference"
    print("KERNEL_OK")
</pallas_src>

<mosaic_0001>
module attributes {stable_mosaic.version = 11 : i64} {
  func.func @_attn_kernel(%arg0: i32, %arg1: memref<2x8x32xf32, #tpu.memory_space<vmem>>, %arg2: memref<2x8xf32, #tpu.memory_space<vmem>>, %arg3: memref<2x1xf32, #tpu.memory_space<vmem>>, %arg4: memref<1x32xf32, #tpu.memory_space<vmem>>, %arg5: memref<2x8xf32, #tpu.memory_space<vmem>>) attributes {dimension_semantics = [#tpu.dimension_semantics<parallel>], iteration_bounds = array<i64: 1>, scalar_prefetch = 0 : i64, scratch_operands = 0 : i64, tpu.core_type = #tpu.core_type<tc>, window_params = [{transform_indices = @transform_0, window_bounds = array<i64: 2, 8, 32>}, {transform_indices = @transform_1, window_bounds = array<i64: 2, 8>}, {transform_indices = @transform_2, window_bounds = array<i64: 2, 1>}, {pipeline_mode = #tpu.pipeline_mode<synchronous>, transform_indices = @transform_3, window_bounds = array<i64: 1, 32>}, {transform_indices = @transform_4, window_bounds = array<i64: 2, 8>}]} {
    %c0 = arith.constant 0 : index
    %c0_0 = arith.constant 0 : index
    %c0_1 = arith.constant 0 : index
    %0 = vector.load %arg1[%c0, %c0_0, %c0_1] : memref<2x8x32xf32, #tpu.memory_space<vmem>>, vector<2x8x32xf32>
    %c0_2 = arith.constant 0 : index
    %c0_3 = arith.constant 0 : index
    %1 = vector.load %arg4[%c0_2, %c0_3] : memref<1x32xf32, #tpu.memory_space<vmem>>, vector<1x32xf32>
    %2 = vector.shape_cast %1 : vector<1x32xf32> to vector<1x1x32xf32>
    %3 = vector.broadcast %2 : vector<1x1x32xf32> to vector<2x8x32xf32>
    %4 = arith.mulf %0, %3 : vector<2x8x32xf32>
    %cst = arith.constant dense<0.000000e+00> : vector<2x8xf32>
    %5 = vector.multi_reduction <add>, %4, %cst [2] : vector<2x8x32xf32> to vector<2x8xf32>
    %c0_4 = arith.constant 0 : index
    %c0_5 = arith.constant 0 : index
    %6 = vector.load %arg3[%c0_4, %c0_5] : memref<2x1xf32, #tpu.memory_space<vmem>>, vector<2x1xf32>
    %7 = vector.broadcast %6 : vector<2x1xf32> to vector<2x8xf32>
    %8 = arith.addf %5, %7 : vector<2x8xf32>
    %c0_6 = arith.constant 0 : index
    %c0_7 = arith.constant 0 : index
    %9 = vector.load %arg2[%c0_6, %c0_7] : memref<2x8xf32, #tpu.memory_space<vmem>>, vector<2x8xf32>
    %10 = math.tanh %8 : vector<2x8xf32>
    %cst_8 = arith.constant 1.000000e+00 : f32
    %11 = vector.broadcast %cst_8 : f32 to vector<2x8xf32>
    %12 = arith.subf %11, %9 : vector<2x8xf32>
    %cst_9 = arith.constant -9.99999979E+10 : f32
    %13 = vector.broadcast %cst_9 : f32 to vector<2x8xf32>
    %14 = arith.mulf %12, %13 : vector<2x8xf32>
    %15 = arith.addf %10, %14 : vector<2x8xf32>
    %cst_10 = arith.constant dense<0xFF800000> : vector<2xf32>
    %16 = vector.multi_reduction <maximumf>, %15, %cst_10 [1] : vector<2x8xf32> to vector<2xf32>
    %17 = vector.shape_cast %16 : vector<2xf32> to vector<2x1xf32>
    %18 = vector.broadcast %17 : vector<2x1xf32> to vector<2x8xf32>
    %19 = arith.subf %15, %18 : vector<2x8xf32>
    %20 = math.exp %19 : vector<2x8xf32>
    %cst_11 = arith.constant dense<0.000000e+00> : vector<2xf32>
    %21 = vector.multi_reduction <add>, %20, %cst_11 [1] : vector<2x8xf32> to vector<2xf32>
    %22 = vector.shape_cast %21 : vector<2xf32> to vector<2x1xf32>
    %23 = tpu.reciprocal %22 {approx = true} : vector<2x1xf32> -> vector<2x1xf32>
    %24 = arith.mulf %22, %23 : vector<2x1xf32>
    %cst_12 = arith.constant 2.000000e+00 : f32
    %25 = vector.broadcast %cst_12 : f32 to vector<2x1xf32>
    %26 = arith.subf %25, %24 : vector<2x1xf32>
    %27 = arith.mulf %23, %26 : vector<2x1xf32>
    %28 = arith.mulf %22, %27 : vector<2x1xf32>
    %cst_13 = arith.constant 2.000000e+00 : f32
    %29 = vector.broadcast %cst_13 : f32 to vector<2x1xf32>
    %30 = arith.subf %29, %28 : vector<2x1xf32>
    %31 = arith.mulf %27, %30 : vector<2x1xf32>
    %32 = vector.broadcast %31 : vector<2x1xf32> to vector<2x8xf32>
    %33 = arith.mulf %20, %32 : vector<2x8xf32>
    %c0_14 = arith.constant 0 : index
    %c0_15 = arith.constant 0 : index
    %34 = vector.load %arg5[%c0_14, %c0_15] : memref<2x8xf32, #tpu.memory_space<vmem>>, vector<2x8xf32>
    tpu.vector_store %arg5[%c0_14, %c0_15], %33 {strides = array<i32>} : memref<2x8xf32, #tpu.memory_space<vmem>>, vector<2x8xf32>,
    return
  }
  func.func @transform_0(%arg0: i32) -> (i32, i32, i32) {
    %c0_i32 = arith.constant 0 : i32
    %c0_i32_0 = arith.constant 0 : i32
    %c0_i32_1 = arith.constant 0 : i32
    return %arg0, %c0_i32, %c0_i32_0 : i32, i32, i32
  }
  func.func @transform_1(%arg0: i32) -> (i32, i32) {
    %c0_i32 = arith.constant 0 : i32
    %c0_i32_0 = arith.constant 0 : i32
    return %arg0, %c0_i32 : i32, i32
  }
  func.func @transform_2(%arg0: i32) -> (i32, i32) {
    %c0_i32 = arith.constant 0 : i32
    %c0_i32_0 = arith.constant 0 : i32
    return %arg0, %c0_i32 : i32, i32
  }
  func.func @transform_3(%arg0: i32) -> (i32, i32) {
    %c0_i32 = arith.constant 0 : i32
    %c0_i32_0 = arith.constant 0 : i32
    %c0_i32_1 = arith.constant 0 : i32
    return %c0_i32, %c0_i32_0 : i32, i32
  }
  func.func @transform_4(%arg0: i32) -> (i32, i32) {
    %c0_i32 = arith.constant 0 : i32
    %c0_i32_0 = arith.constant 0 : i32
    return %arg0, %c0_i32 : i32, i32
  }
}

</mosaic_0001>

<bundles_post_ra>
// kernel: tpu_custom_call.1
= control target key start
LH: loop header
LB: loop body
LE: loop exit
PB: predicated region body
PF: predicated region fallthrough
CT: control target
= control target key end

     0   :  { %9 = vsyncpa [#allocation3], 0  ;;  %s363_s0 = inlined_call_operand.hbm [shape: f32[2,8,32], index: 0, kind: input, shape index: {}]   ;;  %s364_s1 = inlined_call_operand.vmem [shape: f32[2,8], index: 1, kind: input, shape index: {}]   ;;  %s365_s2 = inlined_call_operand.vmem [shape: f32[2,1], index: 2, kind: input, shape index: {}]   ;;  %s366_s3 = inlined_call_operand.vmem [shape: f32[1,32], index: 3, kind: input, shape index: {}]   ;;  %s367_s4 = inlined_call_operand.hbm [shape: f32[2,8], index: 4, kind: output, shape index: {}]  }
   0x1   :  { %10 = vsyncpa [#allocation4], 0  ;;  %s274_s15 = smov [#allocation2]   ;;  %s226_s19 = scalar_lea.hbm %s363_s0, 256 }
   0x2   :  { %s16_s16 = sshll.u32 %s274_s15, 4  ;;  %p227_p0 = scmp.ne.s32.totalorder %s363_s0, %s226_s19  ;;  %s17_s16 = int_to_ptr.vmem [resolvable:$true] %s16_s16 }
   0x3   :  { %p230_p1 = scmp.lt.u32.totalorder %s226_s19, %s363_s0 }
   0x5   :  { %p232_p2 = pnand %p230_p1, %p227_p0 }
   0x7   :  { %235 = shalt.err (!%p232_p2)
}
   0x8   :  { %s236_s24 = scalar_lea.vmem %s17_s16, 256  ;;  %p241_p4 = scmp.lt.s32.totalorder %s17_s16, %s17_s16 }
   0x9   :  { %p237_p3 = scmp.ne.s32.totalorder %s17_s16, %s236_s24  ;;  %p242_p5 = scmp.lt.s32.totalorder %s236_s24, %s236_s24 }
   0xb   :  { %p243_p6 = por %p242_p5, %p241_p4 }
   0xd   :  { %p244_p7 = pnand %p243_p6, %p237_p3 }
   0xf   :  { %247 = shalt.err (!%p244_p7)
}
  0x10   :  { %s275_s25 = smov 128   ;;  %s276_s26 = smov 8  }
  0x11   :  { %22 = dma.hbm_to_vmem [thread:$0]  %s363_s0, 256, %s17_s16, [#allocation3], %s275_s25, %s275_s25, %s276_s26  }
  0x12   :  { %270 = dma.done.wait [#allocation3], 256  }
  0x13   :  { %271 = vsyncadd [#allocation3], 4294967040  ;;  %v277_v0 = vmov 0   ;;  %v55_v1 = vlaneseq  ;;  %v32_v3 = vld [vmem:[#allocation2] sm:$0xff]  ;;  %vm43_vm0 = vcmask 261120   ;;  %v33_v5 = vld [vmem:[#allocation2 + $0x8] sm:$0xff] }
  0x14   :  { %214 = vset.pattern.permute.xlu1 %v277_v0  ;;  %215 = vset.pattern.permute.xlu0 %v277_v0  ;;  %v208_v4 = vld [vmem:[%s366_s3] ss:$0 sm:$0xff]  ;;  %vm109_vm1 = vcmask 1041409   ;;  %vm112_vm2 = vcmask 58368  }
  0x15   :  { %v56_v2 = vshrl.u32 %v55_v1, 7  ;;  %v41_v6 = vmul.f32 %v208_v4, %v32_v3  ;;  %v42_v7 = vmul.f32 %v208_v4, %v33_v5  ;;  %v50_v8 = vld [vmem:[%s365_s2] sm:$0x3]  ;;  %v100_v18 = vand.u32 127, %v55_v1 }
  0x16   :  { %v67_v9 = vld [vmem:[%s364_s1] sm:$0x3]  ;;  %53 = vperm.xlu1 %214, %v50_v8   ;;  %s278_s1 = smov [#allocation5]  }
  0x17   :  { %v325_v10 = vsub.s32 0, %v56_v2  ;;  %v70_v11 = vsub.f32 1.0, %v67_v9  ;;  %v44_v12 = vsel %vm43_vm0, %v41_v6, 0.0  ;;  %v47_v14 = vsel %vm43_vm0, %v42_v7, 0.0  ;;  %s199_s2 = sshll.u32 %s278_s1, 4  ;;  %s200_s2 = int_to_ptr.vmem [resolvable:$true] %s199_s2 }
  0x18   :  { %45 = vadd.xlane.f32.xlu0 %v44_v12  ;;  %v328_v16 = vsub.s32 1, %v56_v2  ;;  %v331_v19 = vsub.s32 %v100_v18, %v56_v2  ;;  %s248_s3 = scalar_lea.vmem %s200_s2, 32  ;;  %p253_p9 = scmp.lt.s32.totalorder %s200_s2, %s200_s2 }
  0x19   :  { %v71_v13 = vmul.f32 -1e+11, %v70_v11  ;;  %p249_p8 = scmp.ne.s32.totalorder %s200_s2, %s248_s3  ;;  %p254_p10 = scmp.lt.s32.totalorder %s248_s3, %s248_s3 }
  0x1b   :  { %v76_v15 = vrot.slane %v71_v13, %v325_v10  ;;  %v83_v17 = vrot.slane %v71_v13, %v328_v16  ;;  %p255_p11 = por %p254_p10, %p253_p9 }
  0x1c   :  { %48 = vadd.xlane.f32.xlu0 %v47_v14 }
  0x1d   :  { %78 = vbcast.lane.b32.xlu1 %v76_v15, 256  ;;  %p256_p12 = pnand %p255_p11, %p249_p8 }
  0x32   :  { %85 = vbcast.lane.b32.xlu0 %v83_v17, 256 }
  0x95   :  { %v54_v20 = vpop.permute.xlu1 %53 }
  0x96   :  { %v58_v21 = vrot.slane %v54_v20, %v325_v10  ;;  %v62_v24 = vrot.slane %v54_v20, %v328_v16 }
  0x99   :  { %v79_v27 = vpop.permute.xlu1 %78 }
  0xa5   :  { %v46_v22 = vpop.xlane.xlu0 %45 }
  0xa6   :  { %v65_v23 = vadd.f32 %v58_v21, %v46_v22 }
  0xa8   :  { %216 = vtanh.f32 %v65_v23 }
  0xa9   :  { %v49_v25 = vpop.xlane.xlu0 %48 }
  0xaa   :  { %v66_v26 = vadd.f32 %v62_v24, %v49_v25 }
  0xac   :  { %218 = vtanh.f32 %v66_v26 }
  0xad   :  { %v86_v30 = vpop.permute.xlu0 %85 }
  0xb2   :  { %v217_v28 = vpop.eup %216 }
  0xb3   :  { %v89_v29 = vadd.f32 %v217_v28, %v79_v27 }
  0xb5   :  { %94 = vperm.xlu1 %214, %v89_v29  }
  0xb6   :  { %v219_v31 = vpop.eup %218 }
  0xb7   :  { %v90_v32 = vadd.f32 %v219_v31, %v86_v30 }
  0xb9   :  { %97 = vperm.xlu1 %214, %v90_v32  }
 0x134   :  { %v95_v33 = vpop.permute.xlu1 %94 }
 0x135   :  { %v104_v35 = vrot.slane %v95_v33, %v331_v19 }
 0x138   :  { %v98_v34 = vpop.permute.xlu1 %97 }
 0x139   :  { %v108_v36 = vrot.slane %v98_v34, %v331_v19 }
 0x13b   :  { %v110_v37 = vsel %vm109_vm1, %v108_v36, %v104_v35 }
 0x13c   :  { %v113_v38 = vsel %vm112_vm2, %v110_v37, -inf }
 0x13d   :  { %114 = vmax.xlane.f32.xlu1 %v113_v38 }
 0x1ca   :  { %v115_v39 = vpop.xlane.xlu1 %114 }
 0x1cb   :  { %v120_v40 = vrot.slane %v115_v39, %v325_v10  ;;  %v124_v41 = vrot.slane %v115_v39, %v328_v16 }
 0x1cd   :  { %v127_v42 = vsub.f32 %v89_v29, %v120_v40  ;;  %v128_v43 = vsub.f32 %v90_v32, %v124_v41 }
 0x1cf   :  { %v129_v44 = vmul.f32 1.442695, %v127_v42  ;;  %v131_v45 = vmul.f32 1.442695, %v128_v43 }
 0x1d1   :  { %220 = vpow2.f32 %v129_v44 }
 0x1d2   :  { %222 = vpow2.f32 %v131_v45 }
 0x1db   :  { %v221_v46 = vpop.eup %220 }
 0x1dc   :  { %136 = vperm.xlu0 %215, %v221_v46   ;;  %v223_v47 = vpop.eup %222 }
 0x1e0   :  { %139 = vperm.xlu0 %215, %v223_v47  }
 0x25b   :  { %v137_v48 = vpop.permute.xlu0 %136 }
 0x25c   :  { %v144_v50 = vrot.slane %v137_v48, %v331_v19 }
 0x25f   :  { %v140_v49 = vpop.permute.xlu0 %139 }
 0x260   :  { %v148_v51 = vrot.slane %v140_v49, %v331_v19 }
 0x262   :  { %v149_v52 = vsel %vm109_vm1, %v148_v51, %v144_v50 }
 0x263   :  { %v151_v53 = vsel %vm112_vm2, %v149_v52, 0.0 }
 0x264   :  { %152 = vadd.xlane.f32.xlu0 %v151_v53 }
 0x2f1   :  { %v153_v54 = vpop.xlane.xlu0 %152 }
 0x2f2   :  { %224 = vrcp.f32 %v153_v54 }
 0x2fc   :  { %v225_v55 = vpop.eup %224 }
 0x2fd   :  { %v155_v56 = vmul.f32 %v225_v55, %v153_v54 }
 0x2ff   :  { %v156_v57 = vsub.f32 2.0, %v155_v56 }
 0x301   :  { %v157_v58 = vmul.f32 %v225_v55, %v156_v57 }
 0x303   :  { %v158_v59 = vmul.f32 %v157_v58, %v153_v54 }
 0x305   :  { %v159_v60 = vsub.f32 2.0, %v158_v59 }
 0x307   :  { %v160_v61 = vmul.f32 %v159_v60, %v157_v58 }
 0x309   :  { %v165_v62 = vrot.slane %v160_v61, %v325_v10  ;;  %v169_v0 = vrot.slane %v160_v61, %v328_v16 }
 0x30b   :  { %v172_v63 = vmul.f32 %v221_v46, %v165_v62  ;;  %v173_v1 = vmul.f32 %v223_v47, %v169_v0 }
 0x30d   :  { %177 = vperm.xlu1 %214, %v172_v63  }
 0x311   :  { %180 = vperm.xlu1 %214, %v173_v1  }
 0x38c   :  { %v178_v2 = vpop.permute.xlu1 %177 }
 0x38d   :  { %v185_v4 = vrot.slane %v178_v2, %v331_v19 }
 0x390   :  { %v181_v3 = vpop.permute.xlu1 %180 }
 0x391   :  { %v189_v5 = vrot.slane %v181_v3, %v331_v19 }
 0x393   :  { %v190_v6 = vsel %vm109_vm1, %v189_v5, %v185_v4 }
 0x394   :  { %192 = vst.msk [vmem:[#allocation5] sm:$0x3] %vm112_vm2, %v190_v6 }
 0x395   :  { %259 = shalt.err (!%p256_p12)
}
 0x396   :  { %s260_s10 = scalar_lea.hbm %s367_s4, 32 }
 0x397   :  { %p261_p13 = scmp.ne.s32.totalorder %s367_s4, %s260_s10  ;;  %p264_p0 = scmp.lt.u32.totalorder %s260_s10, %s367_s4 }
 0x399   :  { %p266_p1 = pnand %p264_p0, %p261_p13 }
 0x39b   :  { %269 = shalt.err (!%p266_p1)
}
 0x39c   :  { %202 = dma.vmem_to_hbm [thread:$0]  %s200_s2, 32, %s367_s4, [#allocation4]  }
 0x39d   :  { %272 = dma.done.wait [#allocation4], 32  }
 0x39e   :  { %273 = vsyncadd [#allocation4], 4294967264 }
 0x39f   :  { %206 = vsyncpa [#allocation3], 1 }
 0x3a0   :  { %207 = vsyncpa [#allocation4], 1 }

</bundles_post_ra>
